<compile_context>
chip_gen: v6e
topology: v6e:2x2x1
jax: 0.10.0
libtpu: 0.0.40
codegen_flags: <defaults>
</compile_context>

<pallas_src>
import jax
import jax.numpy as jnp
from jax.experimental import pallas as pl
from jax.experimental.pallas import tpu as pltpu

SIZE_IN = 16
SIZE_MID = 32
SIZE_OUT = 6
SIZE_MERGED = SIZE_MID + SIZE_OUT  # 38: [h_new | out]

BLOCK_B_CAP = 8192  # double-buffered bf16 working set at this cap ~12 MiB


def rnn_exec_kernel(x_ref, h_ref, w_ih_ref, w_hh_ref, b_rnn_ref, wfc_ref, bfc_ref,
                    merged_ref):
    # RNNCell: h' = tanh(x @ W_ih^T + hx @ W_hh^T + (b_ih + b_hh)); f32 accumulate + tanh.
    pre = (
        jnp.dot(x_ref[...], w_ih_ref[...], preferred_element_type=jnp.float32)
        + jnp.dot(h_ref[...], w_hh_ref[...], preferred_element_type=jnp.float32)
        + b_rnn_ref[...]
    )
    h_new = jnp.tanh(pre)                                            # (block_b, 32) f32
    # fc: out = h' @ W_fc^T + b_fc
    out = (
        jnp.dot(h_new.astype(wfc_ref.dtype), wfc_ref[...],
                preferred_element_type=jnp.float32)
        + bfc_ref[...]
    )                                                                # (block_b, 6) f32
    # Single lane-contiguous store: [h_new | out] -> one output DMA stream.
    merged_ref[...] = jnp.concatenate([h_new, out], axis=-1).astype(merged_ref.dtype)


def _round_up(n, m):
    return ((n + m - 1) // m) * m


def _pick_block_b(B):
    """Fixed large row tile (bf16 sublane quantum 16); Pallas pads the ragged tail."""
    block_b = min(BLOCK_B_CAP, _round_up(B, 16))
    # Guarantee >= 2 grid steps when there is enough work so the "parallel" batch axis
    # can shard across both TensorCores on v7x.
    if B >= 64 and -(-B // block_b) < 2:
        block_b = _round_up(-(-B // 2), 16)
    return block_b


def prepare_params(params):
    """One-time host-side folding: transpose weights to bf16, fold the two RNN biases."""
    return {
        "w_ih_t": params["w_ih"].T.astype(jnp.bfloat16),                       # (16, 32)
        "w_hh_t": params["w_hh"].T.astype(jnp.bfloat16),                       # (32, 32)
        "b_rnn": (params["b_ih"] + params["b_hh"]).reshape(1, SIZE_MID)
                 .astype(jnp.float32),                                         # (1, 32)
        "w_fc_t": params["w_fc"].T.astype(jnp.bfloat16),                       # (32, 6)
        "b_fc": params["b_fc"].reshape(1, SIZE_OUT).astype(jnp.float32),       # (1, 6)
    }


def rnn_execution_forward(x, hx, prepared):
    """One RNN step. Returns (out, hx_first16, hx_last16, hx_new); activations in bf16."""
    B = x.shape[0]
    x_b = x.astype(jnp.bfloat16)
    hx_b = hx.astype(jnp.bfloat16)

    block_b = _pick_block_b(B)
    grid = (pl.cdiv(B, block_b),)

    row_spec = lambda cols: pl.BlockSpec((block_b, cols), lambda i: (i, 0))
    resident = lambda shape: pl.BlockSpec(shape, lambda i: (0, 0))

    merged = pl.pallas_call(
        rnn_exec_kernel,
        out_shape=jax.ShapeDtypeStruct((B, SIZE_MERGED), jnp.bfloat16),
        grid=grid,
        in_specs=[
            row_spec(SIZE_IN),                         # x rows, tiled over batch (bf16)
            row_spec(SIZE_MID),                        # hx rows, tiled over batch (bf16)
            resident((SIZE_IN, SIZE_MID)),             # W_ih^T, VMEM-resident
            resident((SIZE_MID, SIZE_MID)),            # W_hh^T, VMEM-resident
            resident((1, SIZE_MID)),                   # folded RNN bias (f32)
            resident((SIZE_MID, SIZE_OUT)),            # W_fc^T, VMEM-resident
            resident((1, SIZE_OUT)),                   # fc bias (f32)
        ],
        out_specs=row_spec(SIZE_MERGED),               # single merged [h_new | out] stream
        compiler_params=pltpu.CompilerParams(
            dimension_semantics=("parallel",),         # shard batch tiles across TCs (v7x)
            vmem_limit_bytes=32 * 1024 * 1024,
        ),
    )(x_b, hx_b, prepared["w_ih_t"], prepared["w_hh_t"], prepared["b_rnn"],
      prepared["w_fc_t"], prepared["b_fc"])

    hx_new = merged[:, :SIZE_MID]
    out = merged[:, SIZE_MID:]
    # Glue (pure slicing) stays in plain JAX, matching hx[:, :16] / hx[:, 16:].
    return out, hx_new[:, :16], hx_new[:, 16:], hx_new


def init_params(key):
    # Deterministic synthetic init mimicking PyTorch's uniform(-1/sqrt(H), 1/sqrt(H)).
    ks = jax.random.split(key, 6)
    bound = 1.0 / jnp.sqrt(jnp.float32(SIZE_MID))
    u = lambda k, shape: jax.random.uniform(k, shape, jnp.float32, -bound, bound)
    return {
        "w_ih": u(ks[0], (SIZE_MID, SIZE_IN)),    # RNNCell weight_ih
        "w_hh": u(ks[1], (SIZE_MID, SIZE_MID)),   # RNNCell weight_hh
        "b_ih": u(ks[2], (SIZE_MID,)),
        "b_hh": u(ks[3], (SIZE_MID,)),
        "w_fc": u(ks[4], (SIZE_OUT, SIZE_MID)),   # Linear weight
        "b_fc": u(ks[5], (SIZE_OUT,)),
    }


def reference_forward(x, hx, params):
    # f32 reference of the PyTorch semantics, on bf16-rounded inputs/weights to match the
    # kernel's streaming dtype (accumulation/tanh in f32, like the kernel).
    r = lambda a: a.astype(jnp.bfloat16).astype(jnp.float32)
    pre = (r(x) @ r(params["w_ih"]).T + params["b_ih"]
           + r(hx) @ r(params["w_hh"]).T + params["b_hh"])
    h_new = jnp.tanh(pre)
    out = h_new @ r(params["w_fc"]).T + params["b_fc"]
    return out, h_new


if __name__ == "__main__":
    key = jax.random.PRNGKey(0)
    k_param, k_x = jax.random.split(key)

    batch = 2
    params = init_params(k_param)
    prepared = prepare_params(params)                 # one-time folding, off the hot path
    x = jax.random.normal(k_x, (batch, SIZE_IN), jnp.float32)
    hx = jnp.zeros((batch, SIZE_MID), jnp.float32)    # initHidden()

    out, hx_lo, hx_hi, hx_new = rnn_execution_forward(x, hx, prepared)
    jax.block_until_ready((out, hx_lo, hx_hi, hx_new))

    # Correctness check (bf16-streamed activations -> loosened tolerance).
    out_ref, h_ref = reference_forward(x, hx, params)
    assert out.shape == (batch, SIZE_OUT)
    assert hx_lo.shape == (batch, 16) and hx_hi.shape == (batch, 16)
    assert jnp.allclose(out, out_ref, atol=3e-2)
    assert jnp.allclose(hx_new, h_ref, atol=3e-2)
    assert jnp.allclose(hx_lo, h_ref[:, :16], atol=3e-2)
    assert jnp.allclose(hx_hi, h_ref[:, 16:], atol=3e-2)

    # Second step (stateful hx carry, like repeated forward() calls) — exercises reuse.
    out2, _, _, hx_new2 = rnn_execution_forward(x, hx_new, prepared)
    jax.block_until_ready((out2, hx_new2))
    out2_ref, h2_ref = reference_forward(x, hx_new.astype(jnp.float32), params)
    assert jnp.allclose(out2, out2_ref, atol=3e-2)
    assert jnp.allclose(hx_new2, h2_ref, atol=3e-2)

    # Non-multiple-of-16 batch exercises the ragged-tail (padded block) path.
    batch3 = 37
    x3 = jax.random.normal(jax.random.PRNGKey(3), (batch3, SIZE_IN), jnp.float32)
    hx3 = jnp.zeros((batch3, SIZE_MID), jnp.float32)
    out3, _, _, hx3_new = rnn_execution_forward(x3, hx3, prepared)
    jax.block_until_ready((out3, hx3_new))
    out3_ref, h3_ref = reference_forward(x3, hx3, params)
    assert jnp.allclose(out3, out3_ref, atol=3e-2)
    assert jnp.allclose(hx3_new, h3_ref, atol=3e-2)

    print("KERNEL_OK")
</pallas_src>

<mosaic_0001>
module attributes {stable_mosaic.version = 11 : i64} {
  func.func @rnn_exec_kernel(%arg0: i32, %arg1: memref<16x16xbf16, #tpu.memory_space<vmem>>, %arg2: memref<16x32xbf16, #tpu.memory_space<vmem>>, %arg3: memref<16x32xbf16, #tpu.memory_space<vmem>>, %arg4: memref<32x32xbf16, #tpu.memory_space<vmem>>, %arg5: memref<1x32xf32, #tpu.memory_space<vmem>>, %arg6: memref<32x6xbf16, #tpu.memory_space<vmem>>, %arg7: memref<1x6xf32, #tpu.memory_space<vmem>>, %arg8: memref<16x38xbf16, #tpu.memory_space<vmem>>) attributes {dimension_semantics = [#tpu.dimension_semantics<parallel>], iteration_bounds = array<i64: 1>, scalar_prefetch = 0 : i64, scratch_operands = 0 : i64, tpu.core_type = #tpu.core_type<tc>, window_params = [{transform_indices = @transform_0, window_bounds = array<i64: 16, 16>}, {transform_indices = @transform_1, window_bounds = array<i64: 16, 32>}, {pipeline_mode = #tpu.pipeline_mode<synchronous>, transform_indices = @transform_2, window_bounds = array<i64: 16, 32>}, {pipeline_mode = #tpu.pipeline_mode<synchronous>, transform_indices = @transform_3, window_bounds = array<i64: 32, 32>}, {pipeline_mode = #tpu.pipeline_mode<synchronous>, transform_indices = @transform_4, window_bounds = array<i64: 1, 32>}, {pipeline_mode = #tpu.pipeline_mode<synchronous>, transform_indices = @transform_5, window_bounds = array<i64: 32, 6>}, {pipeline_mode = #tpu.pipeline_mode<synchronous>, transform_indices = @transform_6, window_bounds = array<i64: 1, 6>}, {transform_indices = @transform_7, window_bounds = array<i64: 16, 38>}]} {
    %c0 = arith.constant 0 : index
    %c0_0 = arith.constant 0 : index
    %0 = vector.load %arg1[%c0, %c0_0] : memref<16x16xbf16, #tpu.memory_space<vmem>>, vector<16x16xbf16>
    %c0_1 = arith.constant 0 : index
    %c0_2 = arith.constant 0 : index
    %1 = vector.load %arg3[%c0_1, %c0_2] : memref<16x32xbf16, #tpu.memory_space<vmem>>, vector<16x32xbf16>
    %cst = arith.constant dense<0.000000e+00> : vector<16x32xf32>
    %2 = tpu.matmul %0, %1, %cst {dimension_numbers = #tpu.dot_dimension_numbers<[1], [0], [0], [1], [0, 0, 1, 1], [], []>} : vector<16x16xbf16>, vector<16x32xbf16>, vector<16x32xf32> -> vector<16x32xf32>
    %c0_3 = arith.constant 0 : index
    %c0_4 = arith.constant 0 : index
    %3 = vector.load %arg2[%c0_3, %c0_4] : memref<16x32xbf16, #tpu.memory_space<vmem>>, vector<16x32xbf16>
    %c0_5 = arith.constant 0 : index
    %c0_6 = arith.constant 0 : index
    %4 = vector.load %arg4[%c0_5, %c0_6] : memref<32x32xbf16, #tpu.memory_space<vmem>>, vector<32x32xbf16>
    %cst_7 = arith.constant dense<0.000000e+00> : vector<16x32xf32>
    %5 = tpu.matmul %3, %4, %cst_7 {dimension_numbers = #tpu.dot_dimension_numbers<[1], [0], [0], [1], [0, 0, 1, 1], [], []>} : vector<16x32xbf16>, vector<32x32xbf16>, vector<16x32xf32> -> vector<16x32xf32>
    %6 = arith.addf %2, %5 : vector<16x32xf32>
    %c0_8 = arith.constant 0 : index
    %c0_9 = arith.constant 0 : index
    %7 = vector.load %arg5[%c0_8, %c0_9] : memref<1x32xf32, #tpu.memory_space<vmem>>, vector<1x32xf32>
    %8 = vector.broadcast %7 : vector<1x32xf32> to vector<16x32xf32>
    %9 = arith.addf %6, %8 : vector<16x32xf32>
    %10 = math.tanh %9 : vector<16x32xf32>
    %11 = arith.truncf %10 : vector<16x32xf32> to vector<16x32xbf16>
    %c0_10 = arith.constant 0 : index
    %c0_11 = arith.constant 0 : index
    %12 = vector.load %arg6[%c0_10, %c0_11] : memref<32x6xbf16, #tpu.memory_space<vmem>>, vector<32x6xbf16>
    %cst_12 = arith.constant dense<0.000000e+00> : vector<16x6xf32>
    %13 = tpu.matmul %11, %12, %cst_12 {dimension_numbers = #tpu.dot_dimension_numbers<[1], [0], [0], [1], [0, 0, 1, 1], [], []>} : vector<16x32xbf16>, vector<32x6xbf16>, vector<16x6xf32> -> vector<16x6xf32>
    %c0_13 = arith.constant 0 : index
    %c0_14 = arith.constant 0 : index
    %14 = vector.load %arg7[%c0_13, %c0_14] : memref<1x6xf32, #tpu.memory_space<vmem>>, vector<1x6xf32>
    %15 = vector.broadcast %14 : vector<1x6xf32> to vector<16x6xf32>
    %16 = arith.addf %13, %15 : vector<16x6xf32>
    %17 = tpu.concatenate %10, %16 in 1 : vector<16x32xf32>, vector<16x6xf32> -> vector<16x38xf32>
    %18 = arith.truncf %17 : vector<16x38xf32> to vector<16x38xbf16>
    %c0_15 = arith.constant 0 : index
    %c0_16 = arith.constant 0 : index
    %19 = vector.load %arg8[%c0_15, %c0_16] : memref<16x38xbf16, #tpu.memory_space<vmem>>, vector<16x38xbf16>
    tpu.vector_store %arg8[%c0_15, %c0_16], %18 {strides = array<i32>} : memref<16x38xbf16, #tpu.memory_space<vmem>>, vector<16x38xbf16>,
    return
  }
  func.func @transform_0(%arg0: i32) -> (i32, i32) {
    %c0_i32 = arith.constant 0 : i32
    %c0_i32_0 = arith.constant 0 : i32
    return %arg0, %c0_i32 : i32, i32
  }
  func.func @transform_1(%arg0: i32) -> (i32, i32) {
    %c0_i32 = arith.constant 0 : i32
    %c0_i32_0 = arith.constant 0 : i32
    return %arg0, %c0_i32 : i32, i32
  }
  func.func @transform_2(%arg0: i32) -> (i32, i32) {
    %c0_i32 = arith.constant 0 : i32
    %c0_i32_0 = arith.constant 0 : i32
    %c0_i32_1 = arith.constant 0 : i32
    return %c0_i32, %c0_i32_0 : i32, i32
  }
  func.func @transform_3(%arg0: i32) -> (i32, i32) {
    %c0_i32 = arith.constant 0 : i32
    %c0_i32_0 = arith.constant 0 : i32
    %c0_i32_1 = arith.constant 0 : i32
    return %c0_i32, %c0_i32_0 : i32, i32
  }
  func.func @transform_4(%arg0: i32) -> (i32, i32) {
    %c0_i32 = arith.constant 0 : i32
    %c0_i32_0 = arith.constant 0 : i32
    %c0_i32_1 = arith.constant 0 : i32
    return %c0_i32, %c0_i32_0 : i32, i32
  }
  func.func @transform_5(%arg0: i32) -> (i32, i32) {
    %c0_i32 = arith.constant 0 : i32
    %c0_i32_0 = arith.constant 0 : i32
    %c0_i32_1 = arith.constant 0 : i32
    return %c0_i32, %c0_i32_0 : i32, i32
  }
  func.func @transform_6(%arg0: i32) -> (i32, i32) {
    %c0_i32 = arith.constant 0 : i32
    %c0_i32_0 = arith.constant 0 : i32
    %c0_i32_1 = arith.constant 0 : i32
    return %c0_i32, %c0_i32_0 : i32, i32
  }
  func.func @transform_7(%arg0: i32) -> (i32, i32) {
    %c0_i32 = arith.constant 0 : i32
    %c0_i32_0 = arith.constant 0 : i32
    return %arg0, %c0_i32 : i32, i32
  }
}

</mosaic_0001>

<bundles_post_ra>
// kernel: tpu_custom_call.1
= control target key start
LH: loop header
LB: loop body
LE: loop exit
PB: predicated region body
PF: predicated region fallthrough
CT: control target
= control target key end

     0   :  { %12 = vsyncpa [#allocation3], 0  ;;  %s752_s0 = inlined_call_operand.vmem [shape: bf16[2,16], index: 0, kind: input, shape index: {}]   ;;  %s753_s1 = inlined_call_operand.hbm [shape: bf16[2,32], index: 1, kind: input, shape index: {}]   ;;  %s754_s2 = inlined_call_operand.vmem [shape: bf16[16,32], index: 2, kind: input, shape index: {}]   ;;  %s755_s3 = inlined_call_operand.vmem [shape: bf16[32,32], index: 3, kind: input, shape index: {}]   ;;  %s756_s4 = inlined_call_operand.hbm [shape: f32[1,32], index: 4, kind: input, shape index: {}]   ;;  %s757_s5 = inlined_call_operand.vmem [shape: bf16[32,6], index: 5, kind: input, shape index: {}]   ;;  %s758_s6 = inlined_call_operand.vmem [shape: f32[1,6], index: 6, kind: input, shape index: {}]   ;;  %s759_s7 = inlined_call_operand.hbm [shape: bf16[2,38], index: 7, kind: output, shape index: {}]  }
   0x1   :  { %13 = vsyncpa [#allocation6], 0 }
   0x2   :  { %14 = vsyncpa [#allocation4], 0 }
   0x3   :  { %21 = vsyncadd [#allocation3], 112  ;;  %s603_s24 = smov [#allocation2]  }
   0x4   :  { %s22_s25 = sshll.u32 %s603_s24, 4  ;;  %s23_s25 = int_to_ptr.vmem [resolvable:$true] %s22_s25 }
   0x5   :  { %s545_s26 = scalar_lea.vmem %s23_s25, 16  ;;  %s549_s27 = scalar_lea.vmem %s23_s25, 128 }
   0x6   :  { %p546_p0 = scmp.ne.s32.totalorder %s23_s25, %s545_s26  ;;  %p550_p1 = scmp.lt.s32.totalorder %s23_s25, %s23_s25 }
   0x7   :  { %p551_p2 = scmp.lt.s32.totalorder %s549_s27, %s545_s26 }
   0x9   :  { %p552_p3 = por %p551_p2, %p550_p1 }
   0xb   :  { %p553_p4 = pnand %p552_p3, %p546_p0 }
   0xd   :  { %556 = shalt.err (!%p553_p4)
}
   0xe   :  { %s604_s28 = smov 16   ;;  %s605_s29 = smov 1  }
   0xf   :  { %28 = dma.hbm_to_vmem [thread:$0]  %s753_s1, 16, %s23_s25, [#allocation3], %s604_s28, %s604_s28, %s605_s29  }
  0x10   :  { %s606_s9 = smov [#allocation5]  }
  0x11   :  { %s39_s10 = sshll.u32 %s606_s9, 4  ;;  %s40_s10 = int_to_ptr.vmem [resolvable:$true] %s39_s10 }
  0x12   :  { %s565_s11 = scalar_lea.vmem %s40_s10, 16  ;;  %s569_s12 = scalar_lea.vmem %s40_s10, 32 }
  0x13   :  { %p566_p5 = scmp.ne.s32.totalorder %s40_s10, %s565_s11  ;;  %p570_p6 = scmp.lt.s32.totalorder %s40_s10, %s40_s10 }
  0x14   :  { %p571_p7 = scmp.lt.s32.totalorder %s569_s12, %s565_s11 }
  0x16   :  { %p572_p8 = por %p571_p7, %p570_p6 }
  0x18   :  { %p573_p9 = pnand %p572_p8, %p566_p5 }
  0x1a   :  { %576 = shalt.err (!%p573_p9)
}
  0x1b   :  { %42 = dma.hbm_to_vmem [thread:$0]  %s756_s4, 16, %s40_s10, [#allocation6]  }
  0x1c   :  { %597 = dma.done.wait [#allocation3], 128  }
  0x1d   :  { %598 = vsyncadd [#allocation3], 4294967168 }
  0x1e   :  { %599 = dma.done.wait [#allocation6], 16  }
  0x1f   :  { %600 = vsyncadd [#allocation6], 4294967280  ;;  %v607_v0 = vmov 0.0   ;;  %v608_v1 = vmov 1966171168   ;;  %v91_v3 = vlaneseq  ;;  %vm609_vm0 = vmmov 0  }
  0x20   :  { %492 = vmatprep.subr.bf16.mxu0 %v607_v0  ;;  %500 = vmatprep.subr.bf16.mxu1 %v607_v0  ;;  %v89_v2 = vunpack.c.l.s4 %v608_v1  ;;  %v528_v6 = vld [vmem:[%s755_s3 + $0x8] sm:$0xff]   ;;  %v529_v7 = vld [vmem:[%s755_s3] sm:$0xff]   ;;  %vm145_vm1 = vcmask 261120   ;;  %vm253_vm2 = vcmask 130048   ;;  %s610_s4 = smov 32   ;;  %vm446_vm3 = vcmask 303104  }
  0x21   :  { %496 = vmatprep.mubr.msk.bf16.mxu0 %vm609_vm0, %v607_v0  ;;  %502 = vmatprep.mubr.msk.bf16.mxu1 %vm609_vm0, %v607_v0  ;;  %v92_v5 = vshrl.u32 %v91_v3, 7  ;;  %v530_v8 = vld [vmem:[%s754_s2] sm:$0xff]   ;;  %v531_v52 = vld [vmem:[%s757_s5 + $0x8] sm:$0xff]  }
  0x22   :  { %v90_v4 = vunpack.c.0.s8 %v89_v2  ;;  %493 = vmatpush3.bf16.msra.mxu0 %v528_v6  ;;  %v64_v10 = vld [vmem:[#allocation2] sm:$0x1]  ;;  %v65_v11 = vld [vmem:[#allocation2 + $0x1] sm:$0x1]  ;;  %v66_v12 = vld [vmem:[#allocation2 + $0x2] sm:$0x1]  ;;  %501 = vmatpush3.bf16.msra.mxu1 %v530_v8 }
  0x23   :  { %494 = vmatprep.subr.bf16.mxu0 %v607_v0  ;;  %v67_v13 = vld [vmem:[#allocation2 + $0x3] sm:$0x1]  ;;  %v68_v14 = vld [vmem:[#allocation2 + $0x4] sm:$0x1]  ;;  %v69_v15 = vld [vmem:[#allocation2 + $0x5] sm:$0x1]  ;;  %v84_v16 = vcombine.low %v64_v10, %v65_v11  ;;  %506 = vmatprep.subr.bf16.mxu1 %v607_v0 }
  0x24   :  { %v676_v9 = vsub.s32 %v90_v4, %v92_v5  ;;  %v70_v17 = vld [vmem:[#allocation2 + $0x6] sm:$0x1]  ;;  %v71_v18 = vld [vmem:[#allocation2 + $0x7] sm:$0x1]  ;;  %v85_v19 = vcombine.low %v66_v12, %v67_v13  ;;  %v86_v20 = vcombine.low %v68_v14, %v69_v15  ;;  %v54_v21 = vld [vmem:[%s752_s0] sm:$0x1] }
  0x25   :  { %v87_v22 = vcombine.low %v70_v17, %v71_v18  ;;  %v55_v24 = vld [vmem:[%s752_s0 + $0x1] sm:$0x1]  ;;  %v56_v25 = vld [vmem:[%s752_s0 + $0x2] sm:$0x1]  ;;  %v57_v26 = vld [vmem:[%s752_s0 + $0x3] sm:$0x1] }
  0x26   :  { %495 = vmatpush3.bf16.msra.mxu0 %v529_v7  ;;  %v94_v23 = vrot.slane %v84_v16, %v676_v9  ;;  %v101_v27 = vrot.slane %v85_v19, %v676_v9  ;;  %v108_v28 = vrot.slane %v86_v20, %v676_v9  ;;  %v58_v29 = vld [vmem:[%s752_s0 + $0x4] sm:$0x1]  ;;  %v59_v30 = vld [vmem:[%s752_s0 + $0x5] sm:$0x1]  ;;  %v60_v31 = vld [vmem:[%s752_s0 + $0x6] sm:$0x1]  ;;  %v198_v32 = vcombine.low %v54_v21, %v55_v24 }
  0x27   :  { %v199_v33 = vcombine.low %v56_v25, %v57_v26  ;;  %v115_v34 = vrot.slane %v87_v22, %v676_v9  ;;  %v61_v35 = vld [vmem:[%s752_s0 + $0x7] sm:$0x1]  ;;  %v200_v36 = vcombine.low %v58_v29, %v59_v30  ;;  %v478_v58 = vld [vmem:[#allocation5] ss:$0 sm:$0xff]  ;;  %v479_v7 = vld [vmem:[%s758_s6] ss:$0 sm:$0xff] }
  0x28   :  { %v116_v37 = vcombine.low %v94_v23, %v101_v27  ;;  %v201_v38 = vcombine.low %v60_v31, %v61_v35  ;;  %v208_v39 = vrot.slane %v198_v32, %v676_v9  ;;  %v532_v53 = vld [vmem:[%s757_s5] sm:$0xff]  }
  0x29   :  { %v215_v40 = vrot.slane %v199_v33, %v676_v9  ;;  %v117_v41 = vcombine.low %v108_v28, %v115_v34  ;;  %v222_v42 = vrot.slane %v200_v36, %v676_v9 }
  0x2a   :  { %v124_v43 = vrot.slane %v116_v37, %v676_v9  ;;  %v229_v44 = vrot.slane %v201_v38, %v676_v9 }
  0x2b   :  { %v230_v45 = vcombine.low %v208_v39, %v215_v40  ;;  %v131_v46 = vrot.slane %v117_v41, %v676_v9 }
  0x2c   :  { %v231_v47 = vcombine.low %v222_v42, %v229_v44 }
  0x2d   :  { %v238_v48 = vrot.slane %v230_v45, %v676_v9  ;;  %v132_v49 = vcombine.low %v124_v43, %v131_v46 }
  0x2e   :  { %v245_v50 = vrot.slane %v231_v47, %v676_v9 }
  0x2f   :  { %497 = vmatmul.mubr.msk.bf16.vlgmr.msra.gmra.mxu0 %vm145_vm1, %v132_v49 }
  0x30   :  { %v246_v51 = vcombine.low %v238_v48, %v245_v50 }
  0x32   :  { %503 = vmatmul.mubr.msk.bf16.vlgmr.msra.gmra.mxu1 %vm253_vm2, %v246_v51 }
  0x33   :  { %510 = vmatprep.mubr.msk.bf16.mxu1 %vm609_vm0, %v607_v0  ;;  %507 = vmatpush3.bf16.msra.mxu1 %v531_v52 }
  0x34   :  { %508 = vmatprep.subr.bf16.mxu1 %v607_v0 }
  0x37   :  { %509 = vmatpush3.bf16.msra.mxu1 %v532_v53 }
  0xef   :  { %v183_v54 = vpop.f32.mrf.mxu0 }
  0xf1   :  { %v498_v55 = vpop.f32.mrf.mxu0 }
  0xf2   :  { %v291_v56 = vpop.f32.mrf.mxu1 }
  0xf3   :  { %v292_v57 = vadd.f32 %v291_v56, %v183_v54  ;;  %v186_v59 = vpop.f32.mrf.mxu0 }
  0xf4   :  { %v504_v60 = vpop.f32.mrf.mxu1 }
  0xf5   :  { %v499_v61 = vpop.f32.mrf.mxu0  ;;  %v305_v62 = vadd.f32 %v478_v58, %v292_v57 }
  0xf6   :  { %v294_v63 = vpop.f32.mrf.mxu1 }
  0xf7   :  { %v295_v1 = vadd.f32 %v294_v63, %v186_v59  ;;  %533 = vtanh.f32 %v305_v62 }
  0xf8   :  { %v505_v2 = vpop.f32.mrf.mxu1 }
  0xf9   :  { %v306_v3 = vadd.f32 %v478_v58, %v295_v1 }
  0xfb   :  { %535 = vtanh.f32 %v306_v3 }
 0x104   :  { %v534_v4 = vpop.eup %533 }
 0x108   :  { %v536_v5 = vpop.eup %535 }
 0x109   :  { %v309_v6 = vpack.c.bf16 %v536_v5, %v534_v4 }
 0x10b   :  { %511 = vmatmul.mubr.msk.bf16.vlgmr.msra.gmra.mxu1 %vm145_vm1, %v309_v6 }
 0x1cb   :  { %v370_v0 = vpop.f32.mrf.mxu1 }
 0x1cc   :  { %v371_v11 = vadd.f32 %v479_v7, %v370_v0 }
 0x1cd   :  { %v512_v8 = vpop.f32.mrf.mxu1 }
 0x1cf   :  { %v373_v10 = vpop.f32.mrf.mxu1 }
 0x1d0   :  { %v374_v12 = vadd.f32 %v479_v7, %v373_v10 }
 0x1d1   :  { %v513_v13 = vpop.f32.mrf.mxu1 }
 0x1d2   :  { %v523_v14 = vpack.i.bf16 %v374_v12, %v371_v11 }
 0x1d4   :  { %524 = vrot.lane.b32.xlu0 %v523_v14, %s610_s4 }
 0x246   :  { %v525_v15 = vpop.permute.xlu0 %524 }
 0x247   :  { %v527_v16 = vunpack.i.h.bf16 %v525_v15  ;;  %v526_v17 = vunpack.i.l.bf16 %v525_v15 }
 0x249   :  { %v386_v18 = vsel %vm145_vm1, %v536_v5, %v527_v16  ;;  %v385_v19 = vsel %vm145_vm1, %v534_v4, %v526_v17 }
 0x24a   :  { %v483_v20 = vpack.c.bf16 %v386_v18, %v386_v18  ;;  %v387_v21 = vpack.c.bf16 %v386_v18, %v385_v19 }
 0x24c   :  { %v403_v22 = vrot.slane %v483_v20, %v676_v9  ;;  %v396_v23 = vrot.slane %v387_v21, %v676_v9 }
 0x24e   :  { %v405_v24 = vcombine.high %v403_v22, %v403_v22  ;;  %v419_v25 = vrot.slane %v403_v22, %v676_v9  ;;  %v404_v26 = vcombine.high %v396_v23, %v396_v23  ;;  %v412_v27 = vrot.slane %v396_v23, %v676_v9 }
 0x250   :  { %v433_v28 = vrot.slane %v405_v24, %v676_v9  ;;  %v435_v29 = vcombine.high %v419_v25, %v419_v25  ;;  %451 = vst.msk [vmem:[#allocation7 + $0x4] sm:$0x1] %vm446_vm3, %v419_v25  ;;  %v426_v30 = vrot.slane %v404_v26, %v676_v9  ;;  %v434_v31 = vcombine.high %v412_v27, %v412_v27 }
 0x251   :  { %447 = vst.msk [vmem:[#allocation7] sm:$0x1] %vm446_vm3, %v412_v27 }
 0x252   :  { %v437_v32 = vcombine.high %v433_v28, %v433_v28  ;;  %452 = vst.msk [vmem:[#allocation7 + $0x5] sm:$0x1] %vm446_vm3, %v433_v28  ;;  %453 = vst.msk [vmem:[#allocation7 + $0x6] sm:$0x1] %vm446_vm3, %v435_v29  ;;  %v436_v33 = vcombine.high %v426_v30, %v426_v30 }
 0x253   :  { %448 = vst.msk [vmem:[#allocation7 + $0x1] sm:$0x1] %vm446_vm3, %v426_v30  ;;  %449 = vst.msk [vmem:[#allocation7 + $0x2] sm:$0x1] %vm446_vm3, %v434_v31 }
 0x254   :  { %454 = vst.msk [vmem:[#allocation7 + $0x7] sm:$0x1] %vm446_vm3, %v437_v32  ;;  %450 = vst.msk [vmem:[#allocation7 + $0x3] sm:$0x1] %vm446_vm3, %v436_v33 }
 0x255   :  { %459 = vsyncadd [#allocation4], 112  ;;  %s611_s6 = smov [#allocation7]  }
 0x256   :  { %s460_s15 = sshll.u32 %s611_s6, 4  ;;  %s461_s15 = int_to_ptr.vmem [resolvable:$true] %s460_s15 }
 0x257   :  { %s577_s16 = scalar_lea.vmem %s461_s15, 16  ;;  %s581_s17 = scalar_lea.vmem %s461_s15, 128 }
 0x258   :  { %p578_p10 = scmp.ne.s32.totalorder %s461_s15, %s577_s16  ;;  %p582_p11 = scmp.lt.s32.totalorder %s461_s15, %s461_s15 }
 0x259   :  { %p583_p12 = scmp.lt.s32.totalorder %s581_s17, %s577_s16 }
 0x25b   :  { %p584_p13 = por %p583_p12, %p582_p11 }
 0x25d   :  { %p585_p0 = pnand %p584_p13, %p578_p10 }
 0x25f   :  { %588 = shalt.err (!%p585_p0)
}
 0x260   :  { %466 = dma.vmem_to_hbm [thread:$0]  %s461_s15, 16, %s759_s7, [#allocation4], %s604_s28, %s604_s28, %s605_s29  }
 0x261   :  { %601 = dma.done.wait [#allocation4], 128  }
 0x262   :  { %602 = vsyncadd [#allocation4], 4294967168 }
 0x263   :  { %470 = vsyncpa [#allocation3], 1 }
 0x264   :  { %471 = vsyncpa [#allocation6], 1 }
 0x265   :  { %472 = vsyncpa [#allocation4], 1 }

</bundles_post_ra>
